<compile_context>
chip_gen: v7x
topology: tpu7x:2x2x1
jax: 0.10.0
libtpu: 0.0.40
codegen_flags: <defaults>
</compile_context>

<pallas_src>
import functools

import jax
import jax.numpy as jnp
from jax import lax
from jax.experimental import pallas as pl
from jax.experimental.pallas import tpu as pltpu

BN_EPS = 1e-5


def _round_up(x, m):
    return (x + m - 1) // m * m


def ncf_kernel(ui_ref, gmf_ref, w1_ref, w2_ref, w3_ref, vec_ref, out_ref,
               *, d1, d2, d3, E, seg):
    ui = ui_ref[...]               # (TB, 2E)  concat of user|item embeddings
    gmf = gmf_ref[...]             # (TB, E)   precomputed GMF product

    # packed, VMEM-resident small vectors (all slices start at 128-lane bounds)
    b1 = vec_ref[:, 0 * seg:0 * seg + d1]
    b2 = vec_ref[:, 1 * seg:1 * seg + d2]
    b3 = vec_ref[:, 2 * seg:2 * seg + d3]
    wpg = vec_ref[:, 3 * seg:3 * seg + E]
    wpm = vec_ref[:, 4 * seg:4 * seg + d3]
    bp = vec_ref[:, 5 * seg:5 * seg + 1]

    cdt = w1_ref.dtype  # dtype fed to the MXU (f32, or bf16 serving path)

    # MLP layer 1: Linear (BN folded into W/b) -> ReLU  (Dropout = id in eval)
    h = jnp.dot(ui, w1_ref[...], preferred_element_type=jnp.float32) + b1
    h = jnp.maximum(h, 0.0)
    # MLP layer 2: Linear (BN folded) -> ReLU
    h = jnp.dot(h.astype(cdt), w2_ref[...],
                preferred_element_type=jnp.float32) + b2
    h = jnp.maximum(h, 0.0)
    # MLP layer 3 (last MLP layer: no BN / ReLU / Dropout)
    h = jnp.dot(h.astype(cdt), w3_ref[...],
                preferred_element_type=jnp.float32) + b3

    # predict layer on concat([gmf, h]):  N=1 matmuls waste the MXU, so use a
    # VPU multiply + lane (XLU) reduction; fuse the two reductions when d3==E.
    if E == d3:
        s = jnp.sum(gmf * wpg + h * wpm, axis=-1)            # (TB,)
    else:
        s = jnp.sum(gmf * wpg, axis=-1) + jnp.sum(h * wpm, axis=-1)
    out_ref[...] = s[None, :] + bp                            # (1, TB) lane-dense


def make_ncf_params(key, n_user, n_item, embedding_size, mlp_layer_dims):
    """Deterministic synthetic parameters matching the nn.Module shapes."""
    assert len(mlp_layer_dims) == 3, "this kernel is specialized to 3 MLP layers"
    E = embedding_size
    d1, d2, d3 = mlp_layer_dims
    ks = iter(jax.random.split(key, 32))
    nrm = lambda shape, scale=1.0: (scale * jax.random.normal(next(ks), shape)
                                    ).astype(jnp.float32)
    p = {}
    # embeddings
    p["user_emb"] = nrm((n_user, E))
    p["item_emb"] = nrm((n_item, E))
    p["mf_user_emb"] = nrm((n_user, E))
    p["mf_item_emb"] = nrm((n_item, E))
    # MLP linears, stored as [in, out]
    p["w1"] = nrm((2 * E, d1), scale=(2.0 / (2 * E)) ** 0.5)
    p["b1"] = nrm((1, d1), scale=0.1)
    p["w2"] = nrm((d1, d2), scale=(2.0 / d1) ** 0.5)
    p["b2"] = nrm((1, d2), scale=0.1)
    p["w3"] = nrm((d2, d3), scale=(2.0 / d2) ** 0.5)
    p["b3"] = nrm((1, d3), scale=0.1)
    # BatchNorm1d (eval-mode) params for layers 1 and 2
    for name, d in (("1", d1), ("2", d2)):
        p["gamma" + name] = 1.0 + 0.1 * nrm((1, d))
        p["beta" + name] = 0.1 * nrm((1, d))
        p["rmean" + name] = 0.1 * nrm((1, d))
        p["rvar" + name] = 1.0 + 0.5 * jax.random.uniform(next(ks), (1, d),
                                                          dtype=jnp.float32)
    # predict layer: Linear(E + d3 -> 1), split into GMF half and MLP half
    p["wp_gmf"] = nrm((E, 1), scale=(2.0 / (E + d3)) ** 0.5)
    p["wp_mlp"] = nrm((d3, 1), scale=(2.0 / (E + d3)) ** 0.5)
    p["bp"] = nrm((1, 1), scale=0.1)
    return p


def fold_ncf_params(p, embedding_size, *, param_dtype=jnp.float32):
    """Fold eval-mode BN into the linears; pack small vectors into one array."""
    E = embedding_size
    d1 = p["w1"].shape[1]
    d2 = p["w2"].shape[1]
    d3 = p["w3"].shape[1]
    scale1 = p["gamma1"] * lax.rsqrt(p["rvar1"] + BN_EPS)          # (1, d1)
    w1f = p["w1"] * scale1                                         # (2E, d1)
    b1f = (p["b1"] - p["rmean1"]) * scale1 + p["beta1"]            # (1, d1)
    scale2 = p["gamma2"] * lax.rsqrt(p["rvar2"] + BN_EPS)          # (1, d2)
    w2f = p["w2"] * scale2                                         # (d1, d2)
    b2f = (p["b2"] - p["rmean2"]) * scale2 + p["beta2"]            # (1, d2)

    # Pack [b1 | b2 | b3 | wp_gmf^T | wp_mlp^T | bp] into one lane-aligned,
    # VMEM-resident f32 array (128-lane segments -> all in-kernel slices start
    # on a vreg boundary).  Kept f32 even on the bf16 path (it is tiny).
    seg = _round_up(max(d1, d2, d3, E, 1), 128)
    vec = jnp.zeros((1, 6 * seg), jnp.float32)
    vec = vec.at[:, 0 * seg:0 * seg + d1].set(b1f)
    vec = vec.at[:, 1 * seg:1 * seg + d2].set(b2f)
    vec = vec.at[:, 2 * seg:2 * seg + d3].set(p["b3"])
    vec = vec.at[:, 3 * seg:3 * seg + E].set(p["wp_gmf"].T)
    vec = vec.at[:, 4 * seg:4 * seg + d3].set(p["wp_mlp"].T)
    vec = vec.at[:, 5 * seg:5 * seg + 1].set(p["bp"])
    return dict(w1=w1f.astype(param_dtype),
                w2=w2f.astype(param_dtype),
                w3=p["w3"].astype(param_dtype),
                vec=vec, seg=seg, dims=(d1, d2, d3))


def ncf_forward(params, user_id, item_id, *, block_b=2048,
                param_dtype=jnp.float32):
    assert block_b % 128 == 0, "block_b must be a multiple of 128"
    E = params["user_emb"].shape[1]
    fp = fold_ncf_params(params, E, param_dtype=param_dtype)
    d1, d2, d3 = fp["dims"]
    seg = fp["seg"]

    B = user_id.shape[0]
    b_min = _round_up(B, 128)
    tb = min(block_b, b_min)
    # Keep >= 2 grid steps when the batch allows it: the batch axis is the only
    # 'parallel' dimension, and a length-1 grid would leave one of the two v7x
    # TensorCores idle.
    if b_min // tb < 2 and b_min >= 256:
        tb = _round_up((b_min + 1) // 2, 128)
    b_pad = _round_up(b_min, tb)
    pad = b_pad - B
    # Pad with id 0 (a valid row).  Padded rows produce valid-but-unused scores
    # that are sliced off below -- never reduce across the padded batch.
    uid = jnp.pad(user_id, (0, pad))
    iid = jnp.pad(item_id, (0, pad))

    # Glue: embedding gathers + host-side concat / GMF product.  XLA fuses the
    # concat/mul into the gathers, so the kernel is fed by two wide activation
    # streams (B,2E) and (B,E) instead of four narrow (B,E) ones.
    ue = params["user_emb"].astype(param_dtype)
    ie = params["item_emb"].astype(param_dtype)
    mue = params["mf_user_emb"].astype(param_dtype)
    mie = params["mf_item_emb"].astype(param_dtype)
    ui = jnp.concatenate([jnp.take(ue, uid, axis=0),
                          jnp.take(ie, iid, axis=0)], axis=-1)      # (Bp, 2E)
    gmf = jnp.take(mue, uid, axis=0) * jnp.take(mie, iid, axis=0)   # (Bp, E)
    # TODO(synk): for production-size embedding tables, gather inside the
    # kernel (PrefetchScalarGridSpec + manual DMA) to avoid the HBM round-trip
    # of the gathered rows.

    def resident(a):  # full-array block, constant index_map -> stays in VMEM
        return pl.BlockSpec(a.shape, lambda i: (0,) * a.ndim)

    kernel = functools.partial(ncf_kernel, d1=d1, d2=d2, d3=d3, E=E, seg=seg)
    out = pl.pallas_call(
        kernel,
        out_shape=jax.ShapeDtypeStruct((1, b_pad), jnp.float32),
        grid=(b_pad // tb,),
        in_specs=[pl.BlockSpec((tb, 2 * E), lambda i: (i, 0)),
                  pl.BlockSpec((tb, E), lambda i: (i, 0)),
                  resident(fp["w1"]), resident(fp["w2"]), resident(fp["w3"]),
                  resident(fp["vec"])],
        out_specs=pl.BlockSpec((1, tb), lambda i: (0, i)),
        compiler_params=pltpu.CompilerParams(
            dimension_semantics=("parallel",)),
    )(ui, gmf, fp["w1"], fp["w2"], fp["w3"], fp["vec"])

    return out[0, :B].reshape(B, 1)


def ncf_reference(params, user_id, item_id):
    """Pure-JAX reference of the same eval-mode forward (unfolded BN params)."""
    u = jnp.take(params["user_emb"], user_id, axis=0)
    i = jnp.take(params["item_emb"], item_id, axis=0)
    h = jnp.concatenate([u, i], axis=-1)
    h = h @ params["w1"] + params["b1"]
    h = ((h - params["rmean1"]) / jnp.sqrt(params["rvar1"] + BN_EPS)
         * params["gamma1"] + params["beta1"])
    h = jnp.maximum(h, 0.0)
    h = h @ params["w2"] + params["b2"]
    h = ((h - params["rmean2"]) / jnp.sqrt(params["rvar2"] + BN_EPS)
         * params["gamma2"] + params["beta2"])
    h = jnp.maximum(h, 0.0)
    h = h @ params["w3"] + params["b3"]
    gmf = (jnp.take(params["mf_user_emb"], user_id, axis=0)
           * jnp.take(params["mf_item_emb"], item_id, axis=0))
    return gmf @ params["wp_gmf"] + h @ params["wp_mlp"] + params["bp"]


if __name__ == "__main__":
    n_user, n_item = 50, 100
    embedding_size = 16
    mlp_layer_dims = [64, 32, 16]
    batch = 8

    key = jax.random.PRNGKey(0)
    kp, ku, ki = jax.random.split(key, 3)
    params = make_ncf_params(kp, n_user, n_item, embedding_size, mlp_layer_dims)
    user_id = jax.random.randint(ku, (batch,), 0, n_user, dtype=jnp.int32)
    item_id = jax.random.randint(ki, (batch,), 0, n_item, dtype=jnp.int32)

    ref = jax.block_until_ready(ncf_reference(params, user_id, item_id))

    # f32 path (bit-parity target with the PyTorch module in eval mode)
    score = jax.block_until_ready(ncf_forward(params, user_id, item_id))
    assert score.shape == (batch, 1), score.shape
    assert jnp.allclose(score, ref, atol=1e-4, rtol=1e-4), (score, ref)

    # bf16 storage / bf16-MXU path (v6e/v7x serving option; f32 accumulation)
    score_bf16 = jax.block_until_ready(
        ncf_forward(params, user_id, item_id, param_dtype=jnp.bfloat16))
    assert jnp.allclose(score_bf16, ref, atol=5e-2, rtol=5e-2), (score_bf16, ref)

    print("KERNEL_OK")
</pallas_src>

<mosaic_0001>
module attributes {stable_mosaic.version = 11 : i64} {
  func.func @ncf_kernel(%arg0: i32, %arg1: memref<128x32xf32, #tpu.memory_space<vmem>>, %arg2: memref<128x16xf32, #tpu.memory_space<vmem>>, %arg3: memref<32x64xf32, #tpu.memory_space<vmem>>, %arg4: memref<64x32xf32, #tpu.memory_space<vmem>>, %arg5: memref<32x16xf32, #tpu.memory_space<vmem>>, %arg6: memref<1x768xf32, #tpu.memory_space<vmem>>, %arg7: memref<1x128xf32, #tpu.memory_space<vmem>>) attributes {dimension_semantics = [#tpu.dimension_semantics<parallel>], iteration_bounds = array<i64: 1>, scalar_prefetch = 0 : i64, scratch_operands = 0 : i64, tpu.core_type = #tpu.core_type<tc>, window_params = [{transform_indices = @transform_0, window_bounds = array<i64: 128, 32>}, {transform_indices = @transform_1, window_bounds = array<i64: 128, 16>}, {pipeline_mode = #tpu.pipeline_mode<synchronous>, transform_indices = @transform_2, window_bounds = array<i64: 32, 64>}, {pipeline_mode = #tpu.pipeline_mode<synchronous>, transform_indices = @transform_3, window_bounds = array<i64: 64, 32>}, {pipeline_mode = #tpu.pipeline_mode<synchronous>, transform_indices = @transform_4, window_bounds = array<i64: 32, 16>}, {pipeline_mode = #tpu.pipeline_mode<synchronous>, transform_indices = @transform_5, window_bounds = array<i64: 1, 768>}, {transform_indices = @transform_6, window_bounds = array<i64: 1, 128>}]} {
    %c0 = arith.constant 0 : index
    %c0_0 = arith.constant 0 : index
    %0 = vector.load %arg1[%c0, %c0_0] : memref<128x32xf32, #tpu.memory_space<vmem>>, vector<128x32xf32>
    %c0_1 = arith.constant 0 : index
    %c0_2 = arith.constant 0 : index
    %1 = vector.load %arg2[%c0_1, %c0_2] : memref<128x16xf32, #tpu.memory_space<vmem>>, vector<128x16xf32>
    %c0_3 = arith.constant 0 : index
    %c0_4 = arith.constant 0 : index
    %2 = vector.load %arg6[%c0_3, %c0_4] : memref<1x768xf32, #tpu.memory_space<vmem>>, vector<1x64xf32>
    %c0_5 = arith.constant 0 : index
    %c128 = arith.constant 128 : index
    %3 = vector.load %arg6[%c0_5, %c128] : memref<1x768xf32, #tpu.memory_space<vmem>>, vector<1x32xf32>
    %c0_6 = arith.constant 0 : index
    %c256 = arith.constant 256 : index
    %4 = vector.load %arg6[%c0_6, %c256] : memref<1x768xf32, #tpu.memory_space<vmem>>, vector<1x16xf32>
    %c0_7 = arith.constant 0 : index
    %c384 = arith.constant 384 : index
    %5 = vector.load %arg6[%c0_7, %c384] : memref<1x768xf32, #tpu.memory_space<vmem>>, vector<1x16xf32>
    %c0_8 = arith.constant 0 : index
    %c512 = arith.constant 512 : index
    %6 = vector.load %arg6[%c0_8, %c512] : memref<1x768xf32, #tpu.memory_space<vmem>>, vector<1x16xf32>
    %c0_9 = arith.constant 0 : index
    %c640 = arith.constant 640 : index
    %7 = vector.load %arg6[%c0_9, %c640] : memref<1x768xf32, #tpu.memory_space<vmem>>, vector<1x1xf32>
    %c0_10 = arith.constant 0 : index
    %c0_11 = arith.constant 0 : index
    %8 = vector.load %arg3[%c0_10, %c0_11] : memref<32x64xf32, #tpu.memory_space<vmem>>, vector<32x64xf32>
    %cst = arith.constant dense<0.000000e+00> : vector<128x64xf32>
    %9 = tpu.matmul %0, %8, %cst {dimension_numbers = #tpu.dot_dimension_numbers<[1], [0], [0], [1], [0, 0, 1, 1], [], []>} : vector<128x32xf32>, vector<32x64xf32>, vector<128x64xf32> -> vector<128x64xf32>
    %10 = vector.broadcast %2 : vector<1x64xf32> to vector<128x64xf32>
    %11 = arith.addf %9, %10 : vector<128x64xf32>
    %cst_12 = arith.constant 0.000000e+00 : f32
    %12 = vector.broadcast %cst_12 : f32 to vector<128x64xf32>
    %13 = arith.maximumf %11, %12 : vector<128x64xf32>
    %c0_13 = arith.constant 0 : index
    %c0_14 = arith.constant 0 : index
    %14 = vector.load %arg4[%c0_13, %c0_14] : memref<64x32xf32, #tpu.memory_space<vmem>>, vector<64x32xf32>
    %cst_15 = arith.constant dense<0.000000e+00> : vector<128x32xf32>
    %15 = tpu.matmul %13, %14, %cst_15 {dimension_numbers = #tpu.dot_dimension_numbers<[1], [0], [0], [1], [0, 0, 1, 1], [], []>} : vector<128x64xf32>, vector<64x32xf32>, vector<128x32xf32> -> vector<128x32xf32>
    %16 = vector.broadcast %3 : vector<1x32xf32> to vector<128x32xf32>
    %17 = arith.addf %15, %16 : vector<128x32xf32>
    %cst_16 = arith.constant 0.000000e+00 : f32
    %18 = vector.broadcast %cst_16 : f32 to vector<128x32xf32>
    %19 = arith.maximumf %17, %18 : vector<128x32xf32>
    %c0_17 = arith.constant 0 : index
    %c0_18 = arith.constant 0 : index
    %20 = vector.load %arg5[%c0_17, %c0_18] : memref<32x16xf32, #tpu.memory_space<vmem>>, vector<32x16xf32>
    %cst_19 = arith.constant dense<0.000000e+00> : vector<128x16xf32>
    %21 = tpu.matmul %19, %20, %cst_19 {dimension_numbers = #tpu.dot_dimension_numbers<[1], [0], [0], [1], [0, 0, 1, 1], [], []>} : vector<128x32xf32>, vector<32x16xf32>, vector<128x16xf32> -> vector<128x16xf32>
    %22 = vector.broadcast %4 : vector<1x16xf32> to vector<128x16xf32>
    %23 = arith.addf %21, %22 : vector<128x16xf32>
    %24 = vector.broadcast %5 : vector<1x16xf32> to vector<128x16xf32>
    %25 = arith.mulf %1, %24 : vector<128x16xf32>
    %26 = vector.broadcast %6 : vector<1x16xf32> to vector<128x16xf32>
    %27 = arith.mulf %23, %26 : vector<128x16xf32>
    %28 = arith.addf %25, %27 : vector<128x16xf32>
    %cst_20 = arith.constant dense<0.000000e+00> : vector<128xf32>
    %29 = vector.multi_reduction <add>, %28, %cst_20 [1] : vector<128x16xf32> to vector<128xf32>
    %30 = vector.shape_cast %29 : vector<128xf32> to vector<1x128xf32>
    %31 = vector.broadcast %7 : vector<1x1xf32> to vector<1x128xf32>
    %32 = arith.addf %30, %31 : vector<1x128xf32>
    %c0_21 = arith.constant 0 : index
    %c0_22 = arith.constant 0 : index
    %33 = vector.load %arg7[%c0_21, %c0_22] : memref<1x128xf32, #tpu.memory_space<vmem>>, vector<1x128xf32>
    tpu.vector_store %arg7[%c0_21, %c0_22], %32 {strides = array<i32>} : memref<1x128xf32, #tpu.memory_space<vmem>>, vector<1x128xf32>,
    return
  }
  func.func @transform_0(%arg0: i32) -> (i32, i32) {
    %c0_i32 = arith.constant 0 : i32
    %c0_i32_0 = arith.constant 0 : i32
    return %arg0, %c0_i32 : i32, i32
  }
  func.func @transform_1(%arg0: i32) -> (i32, i32) {
    %c0_i32 = arith.constant 0 : i32
    %c0_i32_0 = arith.constant 0 : i32
    return %arg0, %c0_i32 : i32, i32
  }
  func.func @transform_2(%arg0: i32) -> (i32, i32) {
    %c0_i32 = arith.constant 0 : i32
    %c0_i32_0 = arith.constant 0 : i32
    %c0_i32_1 = arith.constant 0 : i32
    return %c0_i32, %c0_i32_0 : i32, i32
  }
  func.func @transform_3(%arg0: i32) -> (i32, i32) {
    %c0_i32 = arith.constant 0 : i32
    %c0_i32_0 = arith.constant 0 : i32
    %c0_i32_1 = arith.constant 0 : i32
    return %c0_i32, %c0_i32_0 : i32, i32
  }
  func.func @transform_4(%arg0: i32) -> (i32, i32) {
    %c0_i32 = arith.constant 0 : i32
    %c0_i32_0 = arith.constant 0 : i32
    %c0_i32_1 = arith.constant 0 : i32
    return %c0_i32, %c0_i32_0 : i32, i32
  }
  func.func @transform_5(%arg0: i32) -> (i32, i32) {
    %c0_i32 = arith.constant 0 : i32
    %c0_i32_0 = arith.constant 0 : i32
    %c0_i32_1 = arith.constant 0 : i32
    return %c0_i32, %c0_i32_0 : i32, i32
  }
  func.func @transform_6(%arg0: i32) -> (i32, i32) {
    %c0_i32 = arith.constant 0 : i32
    %c0_i32_0 = arith.constant 0 : i32
    return %c0_i32, %arg0 : i32, i32
  }
}

</mosaic_0001>

<bundles_post_ra>
// kernel: tpu_custom_call.1
= control target key start
LH: loop header
LB: loop body
LE: loop exit
PB: predicated region body
PF: predicated region fallthrough
CT: control target
= control target key end

     0   :  { %vm72_vm0 = vcmask 261120   ;;  %s1657_s0 = inlined_call_operand.vmem [shape: f32[128,32], index: 0, kind: input, shape index: {}]   ;;  %s1658_s1 = inlined_call_operand.vmem [shape: f32[128,16], index: 1, kind: input, shape index: {}]   ;;  %s1659_s2 = inlined_call_operand.vmem [shape: f32[32,64], index: 2, kind: input, shape index: {}]   ;;  %s1660_s3 = inlined_call_operand.vmem [shape: f32[64,32], index: 3, kind: input, shape index: {}]   ;;  %s1661_s4 = inlined_call_operand.vmem [shape: f32[32,16], index: 4, kind: input, shape index: {}]   ;;  %s1662_s5 = inlined_call_operand.vmem [shape: f32[1,768], index: 5, kind: input, shape index: {}]   ;;  %s1663_s6 = inlined_call_operand.hbm [shape: f32[1,128], index: 6, kind: output, shape index: {}]  }
   0x1   :  { %v62_v0 = vld [vmem:[%s1659_s2] sm:$0xff]  ;;  %v63_v1 = vld [vmem:[%s1659_s2 + $0x8] sm:$0xff]  ;;  %v64_v2 = vld [vmem:[%s1659_s2 + $0x10] sm:$0xff] }
   0x2   :  { %v1207_v3 = vpack.c.bf16 %v63_v1, %v62_v0  ;;  %v65_v4 = vld [vmem:[%s1659_s2 + $0x18] sm:$0xff]  ;;  %v24_v5 = vld [vmem:[%s1657_s0] sm:$0xff]  ;;  %v283_v9 = vld [vmem:[%s1660_s3 + $0x8] sm:$0xff] }
   0x3   :  { %v1211_v6 = vpack.c.bf16 %v65_v4, %v64_v2  ;;  %1111 = vmatprep.mubr.msk.f32.mxu0 %vm72_vm0, %v24_v5  ;;  %v32_v7 = vld [vmem:[%s1657_s0 + $0x40] sm:$0xff]  ;;  %v284_v10 = vld [vmem:[%s1660_s3 + $0x10] sm:$0xff]  ;;  %v285_v11 = vld [vmem:[%s1660_s3 + $0x18] sm:$0xff] }
   0x4   :  { %1208 = vmatprep.subr.bf16.mxu0 %v1207_v3  ;;  %1239 = vmatprep.subr.bf16.mxu1 %v1207_v3  ;;  %v282_v8 = vld [vmem:[%s1660_s3] sm:$0xff]  ;;  %v25_v12 = vld [vmem:[%s1657_s0 + $0x8] sm:$0xff] }
   0x5   :  { %1210 = vmatpush3.bf16.msra.mxu0 %v1207_v3  ;;  %1241 = vmatpush3.bf16.msra.mxu1 %v1207_v3  ;;  %v33_v13 = vld [vmem:[%s1657_s0 + $0x48] sm:$0xff]  ;;  %v1215_v14 = vpack.c.bf16 %v283_v9, %v282_v8 }
   0x6   :  { %1212 = vmatprep.subr.bf16.mxu0 %v1211_v6  ;;  %1240 = vmatprep.subr.bf16.mxu1 %v1211_v6 }
   0x7   :  { %1123 = vmatprep.mubr.msk.f32.mxu1 %vm72_vm0, %v32_v7 }
   0x9   :  { %1214 = vmatpush3.bf16.msra.mxu0 %v1211_v6  ;;  %1242 = vmatpush3.bf16.msra.mxu1 %v1211_v6 }
   0xa   :  { %11 = vsyncpa [#allocation3], 0  ;;  %v26_v15 = vld [vmem:[%s1657_s0 + $0x10] sm:$0xff]  ;;  %1216 = vmatprep.subr.bf16.mxu1 %v1215_v14  ;;  %v1219_v17 = vpack.c.bf16 %v285_v11, %v284_v10  ;;  %v286_v18 = vld [vmem:[%s1660_s3 + $0x20] sm:$0xff]  ;;  %vm296_vm1 = vcmask 523264   ;;  %vm769_vm2 = vcmask 130048  }
   0xb   :  { %v34_v16 = vld [vmem:[%s1657_s0 + $0x50] sm:$0xff]  ;;  %v287_v19 = vld [vmem:[%s1660_s3 + $0x28] sm:$0xff]  ;;  %v27_v20 = vld [vmem:[%s1657_s0 + $0x18] sm:$0xff]  ;;  %vm870_vm3 = vcmask 130112   ;;  %vm877_vm4 = vcmask 195712   ;;  %vm884_vm5 = vcmask 261312  }
   0xc   :  { %1112 = vmatmul.mubr.msk.f32.vlgmr.msra.gmra.mrb[0].mxu0 %vm72_vm0, %v25_v12  ;;  %1124 = vmatmul.mubr.msk.f32.vlgmr.msra.gmra.mrb[0].mxu1 %vm72_vm0, %v33_v13  ;;  %v35_v21 = vld [vmem:[%s1657_s0 + $0x58] sm:$0xff]  ;;  %v28_v22 = vld [vmem:[%s1657_s0 + $0x20] sm:$0xff]  ;;  %v1223_v24 = vpack.c.bf16 %v287_v19, %v286_v18  ;;  %v29_v25 = vld [vmem:[%s1657_s0 + $0x28] sm:$0xff]  ;;  %vm891_vm6 = vcmask 326912   ;;  %vm898_vm7 = vcmask 392512   ;;  %vm905_vm8 = vcmask 458112  }
   0xd   :  { %1114 = vmatprep.mubr.msk.f32.mxu0 %vm72_vm0, %v26_v15  ;;  %1126 = vmatprep.mubr.msk.f32.mxu1 %vm72_vm0, %v34_v16  ;;  %v36_v23 = vld [vmem:[%s1657_s0 + $0x60] sm:$0xff]  ;;  %v37_v26 = vld [vmem:[%s1657_s0 + $0x68] sm:$0xff]  ;;  %v30_v27 = vld [vmem:[%s1657_s0 + $0x30] sm:$0xff]  ;;  %vm912_vm9 = vcmask 523712   ;;  %vm919_vm10 = vcmask 589312   ;;  %vm926_vm11 = vcmask 654912  }
   0xe   :  { %1218 = vmatpush3.bf16.msra.mxu1 %v1215_v14  ;;  %v38_v28 = vld [vmem:[%s1657_s0 + $0x70] sm:$0xff]  ;;  %v31_v29 = vld [vmem:[%s1657_s0 + $0x38] sm:$0xff]  ;;  %v506_v34 = vld [vmem:[%s1661_s4] sm:$0xff]  ;;  %vm933_vm12 = vcmask 720512   ;;  %vm940_vm13 = vcmask 786112   ;;  %vm947_vm14 = vcmask 851712  }
   0xf   :  { %1220 = vmatprep.subr.bf16.mxu1 %v1219_v17  ;;  %v39_v30 = vld [vmem:[%s1657_s0 + $0x78] sm:$0xff]  ;;  %v288_v31 = vld [vmem:[%s1660_s3 + $0x30] sm:$0xff]  ;;  %v507_v35 = vld [vmem:[%s1661_s4 + $0x8] sm:$0xff]  ;;  %vm954_vm15 = vcmask 917312  }
  0x10   :  { %1115 = vmatmul.mubr.msk.f32.gmra.mrb[2].mxu0 %vm72_vm0, %v27_v20  ;;  %1127 = vmatmul.mubr.msk.f32.gmra.mrb[2].mxu1 %vm72_vm0, %v35_v21  ;;  %v289_v32 = vld [vmem:[%s1660_s3 + $0x38] sm:$0xff]  ;;  %v508_v36 = vld [vmem:[%s1661_s4 + $0x10] sm:$0xff]  ;;  %v1231_v37 = vpack.c.bf16 %v507_v35, %v506_v34  ;;  %v986_v40 = vld [vmem:[%s1662_s5] ss:$0 sm:$0xff] }
  0x11   :  { %1117 = vmatprep.mubr.msk.f32.mxu0 %vm72_vm0, %v28_v22  ;;  %1129 = vmatprep.mubr.msk.f32.mxu1 %vm72_vm0, %v36_v23  ;;  %v1227_v33 = vpack.c.bf16 %v289_v32, %v288_v31  ;;  %v509_v38 = vld [vmem:[%s1661_s4 + $0x18] sm:$0xff] }
  0x12   :  { %1222 = vmatpush3.bf16.msra.mxu1 %v1219_v17  ;;  %v1235_v39 = vpack.c.bf16 %v509_v38, %v508_v36  ;;  %1232 = vmatprep.subr.bf16.mxu0 %v1231_v37 }
  0x13   :  { %1224 = vmatprep.subr.bf16.mxu1 %v1223_v24  ;;  %1234 = vmatpush3.bf16.msra.mxu0 %v1231_v37 }
  0x14   :  { %1118 = vmatmul.mubr.msk.f32.gmra.mrb[4].mxu0 %vm72_vm0, %v29_v25  ;;  %1130 = vmatmul.mubr.msk.f32.gmra.mrb[4].mxu1 %vm72_vm0, %v37_v26  ;;  %v1003_v25 = vld [vmem:[%s1662_s5 + $0x1] ss:$0 sm:$0xff] }
  0x15   :  { %1120 = vmatprep.mubr.msk.f32.mxu0 %vm72_vm0, %v30_v27  ;;  %1132 = vmatprep.mubr.msk.f32.mxu1 %vm72_vm0, %v38_v28 }
  0x16   :  { %1226 = vmatpush3.bf16.msra.mxu1 %v1223_v24  ;;  %1236 = vmatprep.subr.bf16.mxu0 %v1235_v39 }
  0x17   :  { %1228 = vmatprep.subr.bf16.mxu1 %v1227_v33  ;;  %1238 = vmatpush3.bf16.msra.mxu0 %v1235_v39 }
  0x18   :  { %1121 = vmatmul.mubr.msk.f32.gmra.mrb[6].mxu0 %vm72_vm0, %v31_v29  ;;  %1133 = vmatmul.mubr.msk.f32.gmra.mrb[6].mxu1 %vm72_vm0, %v39_v30 }
  0x1a   :  { %1230 = vmatpush3.bf16.msra.mxu1 %v1227_v33 }
  0xdf   :  { %v1113_v41 = vpop.f32.mrb[0].mxu0  ;;  %v1125_v42 = vpop.f32.mrb[0].mxu1 }
  0xe0   :  { %v193_v43 = vadd.f32 %v1113_v41, %v986_v40  ;;  %v187_v44 = vpop.f32.mrb[1].mxu0  ;;  %v227_v45 = vpop.f32.mrb[1].mxu1  ;;  %v233_v9 = vadd.f32 %v1125_v42, %v986_v40 }
  0xe1   :  { %v188_v46 = vadd.f32 %v986_v40, %v187_v44  ;;  %v228_v2 = vadd.f32 %v986_v40, %v227_v45 }
  0xe2   :  { %v267_v50 = vmax.f32 %v193_v43, 0.0  ;;  %v275_v13 = vmax.f32 %v233_v9, 0.0 }
  0xe3   :  { %v266_v47 = vmax.f32 %v188_v46, 0.0  ;;  %v1116_v48 = vpop.f32.mrb[2].mxu0  ;;  %v1128_v49 = vpop.f32.mrb[2].mxu1  ;;  %v274_v11 = vmax.f32 %v228_v2, 0.0 }
  0xe4   :  { %v203_v51 = vadd.f32 %v1116_v48, %v986_v40  ;;  %v197_v52 = vpop.f32.mrb[3].mxu0  ;;  %v237_v53 = vpop.f32.mrb[3].mxu1  ;;  %v243_v14 = vadd.f32 %v1128_v49, %v986_v40 }
  0xe5   :  { %v198_v54 = vadd.f32 %v986_v40, %v197_v52  ;;  %1151 = vmatprep.mubr.msk.f32.mxu1 %vm296_vm1, %v266_v47  ;;  %v238_v12 = vadd.f32 %v986_v40, %v237_v53 }
  0xe6   :  { %1152 = vmatmul.mubr.msk.f32.vlgmr.msra.gmra.mrb[8].mxu1 %vm296_vm1, %v267_v50  ;;  %v269_v58 = vmax.f32 %v203_v51, 0.0  ;;  %v277_v17 = vmax.f32 %v243_v14, 0.0  ;;  %v1474_v14 = vld [vmem:[%s1662_s5 + $0x4] ss:$0 sm:$0xff] }
  0xe7   :  { %v268_v55 = vmax.f32 %v198_v54, 0.0  ;;  %v1119_v56 = vpop.f32.mrb[4].mxu0  ;;  %v1131_v57 = vpop.f32.mrb[4].mxu1  ;;  %v276_v15 = vmax.f32 %v238_v12, 0.0  ;;  %v41_v12 = vld [vmem:[%s1658_s1 + $0x8] sm:$0xff] }
  0xe8   :  { %v213_v59 = vadd.f32 %v1119_v56, %v986_v40  ;;  %v207_v60 = vpop.f32.mrb[5].mxu0  ;;  %v247_v61 = vpop.f32.mrb[5].mxu1  ;;  %v253_v18 = vadd.f32 %v1131_v57, %v986_v40 }
  0xe9   :  { %v208_v62 = vadd.f32 %v986_v40, %v207_v60  ;;  %1154 = vmatprep.mubr.msk.f32.mxu1 %vm296_vm1, %v268_v55  ;;  %v248_v16 = vadd.f32 %v986_v40, %v247_v61 }
  0xea   :  { %v271_v63 = vmax.f32 %v213_v59, 0.0  ;;  %1155 = vmatmul.mubr.msk.f32.gmra.mrb[10].mxu1 %vm296_vm1, %v269_v58  ;;  %v279_v21 = vmax.f32 %v253_v18, 0.0 }
  0xeb   :  { %v270_v0 = vmax.f32 %v208_v62, 0.0  ;;  %v1122_v1 = vpop.f32.mrb[6].mxu0  ;;  %v1134_v3 = vpop.f32.mrb[6].mxu1  ;;  %v278_v19 = vmax.f32 %v248_v16, 0.0  ;;  %v40_v16 = vld [vmem:[%s1658_s1] sm:$0xff] }
  0xec   :  { %v223_v4 = vadd.f32 %v1122_v1, %v986_v40  ;;  %v217_v5 = vpop.f32.mrb[7].mxu0  ;;  %v257_v6 = vpop.f32.mrb[7].mxu1  ;;  %v263_v22 = vadd.f32 %v1134_v3, %v986_v40 }
  0xed   :  { %v218_v7 = vadd.f32 %v986_v40, %v217_v5  ;;  %1157 = vmatprep.mubr.msk.f32.mxu1 %vm296_vm1, %v270_v0  ;;  %v258_v20 = vadd.f32 %v986_v40, %v257_v6 }
  0xee   :  { %v273_v8 = vmax.f32 %v223_v4, 0.0  ;;  %1158 = vmatmul.mubr.msk.f32.gmra.mrb[12].mxu1 %vm296_vm1, %v271_v63  ;;  %v281_v24 = vmax.f32 %v263_v22, 0.0 }
  0xef   :  { %v272_v10 = vmax.f32 %v218_v7, 0.0  ;;  %v280_v23 = vmax.f32 %v258_v20, 0.0 }
  0xf1   :  { %1160 = vmatprep.mubr.msk.f32.mxu1 %vm296_vm1, %v272_v10  ;;  %v1271_v10 = vmov 0  }
  0xf2   :  { %1161 = vmatmul.mubr.msk.f32.gmra.mrb[14].mxu1 %vm296_vm1, %v273_v8  ;;  %1245 = vset.pattern.permute.xlu1 %v1271_v10 }
  0xf3   :  { %1163 = vmatprep.mubr.msk.f32.mxu1 %vm296_vm1, %v274_v11  ;;  %1246 = vset.pattern.permute.xlu0 %v1271_v10  ;;  %v1461_v11 = vld [vmem:[%s1662_s5 + $0x2] ss:$0 sm:$0xff]  ;;  %v51_v10 = vld [vmem:[%s1658_s1 + $0x58] sm:$0xff] }
  0xf6   :  { %1164 = vmatmul.mubr.msk.f32.gmra.mrb[16].mxu1 %vm296_vm1, %v275_v13  ;;  %v1469_v13 = vld [vmem:[%s1662_s5 + $0x3] ss:$0 sm:$0xff] }
  0xf7   :  { %1166 = vmatprep.mubr.msk.f32.mxu1 %vm296_vm1, %v276_v15 }
  0xfa   :  { %1167 = vmatmul.mubr.msk.f32.gmra.mrb[18].mxu1 %vm296_vm1, %v277_v17 }
  0xfb   :  { %1169 = vmatprep.mubr.msk.f32.mxu1 %vm296_vm1, %v278_v19  ;;  %v716_v19 = vmul.f32 %v1469_v13, %v41_v12 }
  0xfe   :  { %1170 = vmatmul.mubr.msk.f32.gmra.mrb[20].mxu1 %vm296_vm1, %v279_v21  ;;  %v43_v21 = vld [vmem:[%s1658_s1 + $0x18] sm:$0xff] }
  0xff   :  { %1172 = vmatprep.mubr.msk.f32.mxu1 %vm296_vm1, %v280_v23  ;;  %v715_v23 = vmul.f32 %v1469_v13, %v40_v16 }
 0x102   :  { %1173 = vmatmul.mubr.msk.f32.gmra.mrb[22].mxu1 %vm296_vm1, %v281_v24  ;;  %vm968_vm1 = vcmask 1048512  }
 0x1b9   :  { %v1153_v26 = vpop.f32.mrb[8].mxu1 }
 0x1ba   :  { %v417_v27 = vadd.f32 %v1153_v26, %v1003_v25  ;;  %v411_v28 = vpop.f32.mrb[9].mxu1  ;;  %v42_v26 = vld [vmem:[%s1658_s1 + $0x10] sm:$0xff] }
 0x1bb   :  { %v412_v29 = vadd.f32 %v1003_v25, %v411_v28 }
 0x1bc   :  { %v491_v32 = vmax.f32 %v417_v27, 0.0 }
 0x1bd   :  { %v490_v30 = vmax.f32 %v412_v29, 0.0  ;;  %v1156_v31 = vpop.f32.mrb[10].mxu1 }
 0x1be   :  { %v427_v33 = vadd.f32 %v1156_v31, %v1003_v25  ;;  %v421_v34 = vpop.f32.mrb[11].mxu1 }
 0x1bf   :  { %v422_v35 = vadd.f32 %v1003_v25, %v421_v34  ;;  %1183 = vmatprep.mubr.msk.f32.mxu0 %vm72_vm0, %v490_v30  ;;  %v718_v30 = vmul.f32 %v1469_v13, %v43_v21  ;;  %v726_v21 = vmul.f32 %v1469_v13, %v51_v10 }
 0x1c0   :  { %1184 = vmatmul.mubr.msk.f32.vlgmr.msra.gmra.mrb[8].mxu0 %vm72_vm0, %v491_v32  ;;  %v493_v38 = vmax.f32 %v427_v33, 0.0 }
 0x1c1   :  { %v492_v36 = vmax.f32 %v422_v35, 0.0  ;;  %v1159_v37 = vpop.f32.mrb[12].mxu1  ;;  %v717_v35 = vmul.f32 %v1469_v13, %v42_v26  ;;  %v50_v26 = vld [vmem:[%s1658_s1 + $0x50] sm:$0xff] }
 0x1c2   :  { %v437_v39 = vadd.f32 %v1159_v37, %v1003_v25  ;;  %v431_v40 = vpop.f32.mrb[13].mxu1  ;;  %v45_v37 = vld [vmem:[%s1658_s1 + $0x28] sm:$0xff] }
 0x1c3   :  { %v432_v41 = vadd.f32 %v1003_v25, %v431_v40  ;;  %1186 = vmatprep.mubr.msk.f32.mxu0 %vm72_vm0, %v492_v36  ;;  %v44_v36 = vld [vmem:[%s1658_s1 + $0x20] sm:$0xff] }
 0x1c4   :  { %v495_v42 = vmax.f32 %v437_v39, 0.0  ;;  %1187 = vmatmul.mubr.msk.f32.gmra.mrb[10].mxu0 %vm72_vm0, %v493_v38 }
 0x1c5   :  { %v494_v43 = vmax.f32 %v432_v41, 0.0  ;;  %v1162_v44 = vpop.f32.mrb[14].mxu1 }
 0x1c6   :  { %v447_v45 = vadd.f32 %v1162_v44, %v1003_v25  ;;  %v441_v46 = vpop.f32.mrb[15].mxu1  ;;  %v719_v44 = vmul.f32 %v1469_v13, %v44_v36  ;;  %v53_v36 = vld [vmem:[%s1658_s1 + $0x68] sm:$0xff] }
 0x1c7   :  { %v442_v47 = vadd.f32 %v1003_v25, %v441_v46  ;;  %1189 = vmatprep.mubr.msk.f32.mxu0 %vm72_vm0, %v494_v43  ;;  %v47_v46 = vld [vmem:[%s1658_s1 + $0x38] sm:$0xff] }
 0x1c8   :  { %v497_v48 = vmax.f32 %v447_v45, 0.0  ;;  %1190 = vmatmul.mubr.msk.f32.gmra.mrb[12].mxu0 %vm72_vm0, %v495_v42  ;;  %v720_v45 = vmul.f32 %v1469_v13, %v45_v37 }
 0x1c9   :  { %v496_v49 = vmax.f32 %v442_v47, 0.0  ;;  %v1165_v50 = vpop.f32.mrb[16].mxu1 }
 0x1ca   :  { %v457_v51 = vadd.f32 %v1165_v50, %v1003_v25  ;;  %v451_v52 = vpop.f32.mrb[17].mxu1 }
 0x1cb   :  { %1192 = vmatprep.mubr.msk.f32.mxu0 %vm72_vm0, %v496_v49  ;;  %v452_v53 = vadd.f32 %v1003_v25, %v451_v52 }
 0x1cc   :  { %1193 = vmatmul.mubr.msk.f32.gmra.mrb[14].mxu0 %vm72_vm0, %v497_v48  ;;  %v499_v54 = vmax.f32 %v457_v51, 0.0  ;;  %v46_v51 = vld [vmem:[%s1658_s1 + $0x30] sm:$0xff] }
 0x1cd   :  { %v498_v55 = vmax.f32 %v452_v53, 0.0  ;;  %v1168_v56 = vpop.f32.mrb[18].mxu1 }
 0x1ce   :  { %v467_v57 = vadd.f32 %v1168_v56, %v1003_v25  ;;  %v461_v58 = vpop.f32.mrb[19].mxu1  ;;  %v722_v56 = vmul.f32 %v1469_v13, %v47_v46 }
 0x1cf   :  { %1195 = vmatprep.mubr.msk.f32.mxu0 %vm72_vm0, %v498_v55  ;;  %v462_v59 = vadd.f32 %v1003_v25, %v461_v58 }
 0x1d0   :  { %v501_v60 = vmax.f32 %v467_v57, 0.0  ;;  %1196 = vmatmul.mubr.msk.f32.gmra.mrb[16].mxu0 %vm72_vm0, %v499_v54 }
 0x1d1   :  { %v500_v61 = vmax.f32 %v462_v59, 0.0  ;;  %v1171_v62 = vpop.f32.mrb[20].mxu1  ;;  %v721_v59 = vmul.f32 %v1469_v13, %v46_v51 }
 0x1d2   :  { %v477_v63 = vadd.f32 %v1171_v62, %v1003_v25  ;;  %v471_v0 = vpop.f32.mrb[21].mxu1 }
 0x1d3   :  { %v472_v1 = vadd.f32 %v1003_v25, %v471_v0  ;;  %1198 = vmatprep.mubr.msk.f32.mxu0 %vm72_vm0, %v500_v61 }
 0x1d4   :  { %v503_v2 = vmax.f32 %v477_v63, 0.0  ;;  %1199 = vmatmul.mubr.msk.f32.gmra.mrb[18].mxu0 %vm72_vm0, %v501_v60  ;;  %v49_v63 = vld [vmem:[%s1658_s1 + $0x48] sm:$0xff] }
 0x1d5   :  { %v502_v3 = vmax.f32 %v472_v1, 0.0  ;;  %v1174_v4 = vpop.f32.mrb[22].mxu1 }
 0x1d6   :  { %v487_v5 = vadd.f32 %v1174_v4, %v1003_v25  ;;  %v481_v6 = vpop.f32.mrb[23].mxu1 }
 0x1d7   :  { %1201 = vmatprep.mubr.msk.f32.mxu0 %vm72_vm0, %v502_v3  ;;  %v482_v7 = vadd.f32 %v1003_v25, %v481_v6 }
 0x1d8   :  { %v505_v8 = vmax.f32 %v487_v5, 0.0  ;;  %1202 = vmatmul.mubr.msk.f32.gmra.mrb[20].mxu0 %vm72_vm0, %v503_v2 }
 0x1d9   :  { %v504_v9 = vmax.f32 %v482_v7, 0.0 }
 0x1db   :  { %1204 = vmatprep.mubr.msk.f32.mxu0 %vm72_vm0, %v504_v9  ;;  %v48_v9 = vld [vmem:[%s1658_s1 + $0x40] sm:$0xff] }
 0x1dc   :  { %1205 = vmatmul.mubr.msk.f32.gmra.mrb[22].mxu0 %vm72_vm0, %v505_v8  ;;  %v724_v8 = vmul.f32 %v1469_v13, %v49_v63  ;;  %vm961_vm0 = vcmask 982912  }
 0x293   :  { %v1185_v15 = vpop.f32.mrb[8].mxu0 }
 0x294   :  { %v636_v17 = vadd.f32 %v1185_v15, %v1461_v11  ;;  %v630_v18 = vpop.f32.mrb[9].mxu0 }
 0x295   :  { %v631_v20 = vadd.f32 %v1461_v11, %v630_v18 }
 0x296   :  { %v738_v22 = vmul.f32 %v1474_v14, %v636_v17 }
 0x297   :  { %v737_v24 = vmul.f32 %v1474_v14, %v631_v20  ;;  %v1188_v25 = vpop.f32.mrb[10].mxu0  ;;  %v723_v20 = vmul.f32 %v1469_v13, %v48_v9 }
 0x298   :  { %v646_v27 = vadd.f32 %v1188_v25, %v1461_v11  ;;  %v640_v28 = vpop.f32.mrb[11].mxu0  ;;  %v754_v29 = vadd.f32 %v738_v22, %v716_v19 }
 0x299   :  { %v641_v31 = vadd.f32 %v1461_v11, %v640_v28  ;;  %v753_v34 = vadd.f32 %v737_v24, %v715_v23 }
 0x29a   :  { %v740_v32 = vmul.f32 %v1474_v14, %v646_v27  ;;  %v773_v33 = vsel %vm769_vm2, %v754_v29, 0.0 }
 0x29b   :  { %v739_v38 = vmul.f32 %v1474_v14, %v641_v31  ;;  %774 = vadd.xlane.f32.xlu0 %v773_v33  ;;  %v1191_v39 = vpop.f32.mrb[12].mxu0  ;;  %v770_v49 = vsel %vm769_vm2, %v753_v34, 0.0 }
 0x29c   :  { %v656_v40 = vadd.f32 %v1191_v39, %v1461_v11  ;;  %v650_v41 = vpop.f32.mrb[13].mxu0  ;;  %v756_v42 = vadd.f32 %v740_v32, %v718_v30  ;;  %v725_v30 = vmul.f32 %v1469_v13, %v50_v26 }
 0x29d   :  { %v651_v43 = vadd.f32 %v1461_v11, %v650_v41  ;;  %v755_v50 = vadd.f32 %v739_v38, %v717_v35 }
 0x29e   :  { %v742_v47 = vmul.f32 %v1474_v14, %v656_v40  ;;  %v779_v48 = vsel %vm769_vm2, %v756_v42, 0.0  ;;  %v728_v40 = vmul.f32 %v1469_v13, %v53_v36 }
 0x29f   :  { %v741_v52 = vmul.f32 %v1474_v14, %v651_v43  ;;  %780 = vadd.xlane.f32.xlu1 %v779_v48  ;;  %771 = vadd.xlane.f32.xlu0 %v770_v49  ;;  %v1194_v53 = vpop.f32.mrb[14].mxu0  ;;  %v776_v61 = vsel %vm769_vm2, %v755_v50, 0.0  ;;  %v61_v48 = vld [vmem:[%s1662_s5 + $0x5] sm:$0x1] }
 0x2a0   :  { %v666_v54 = vadd.f32 %v1194_v53, %v1461_v11  ;;  %v660_v55 = vpop.f32.mrb[15].mxu0  ;;  %v758_v62 = vadd.f32 %v742_v47, %v720_v45  ;;  %v52_v45 = vld [vmem:[%s1658_s1 + $0x60] sm:$0xff] }
 0x2a1   :  { %v661_v57 = vadd.f32 %v1461_v11, %v660_v55  ;;  %v757_v58 = vadd.f32 %v741_v52, %v719_v44  ;;  %v727_v46 = vmul.f32 %v1469_v13, %v52_v45  ;;  %v54_v52 = vld [vmem:[%s1658_s1 + $0x70] sm:$0xff] }
 0x2a2   :  { %v744_v60 = vmul.f32 %v1474_v14, %v666_v54  ;;  %v785_v12 = vsel %vm769_vm2, %v758_v62, 0.0  ;;  %v729_v53 = vmul.f32 %v1469_v13, %v54_v52 }
 0x2a3   :  { %777 = vadd.xlane.f32.xlu1 %v776_v61  ;;  %v743_v0 = vmul.f32 %v1474_v14, %v661_v57  ;;  %v782_v1 = vsel %vm769_vm2, %v757_v58, 0.0  ;;  %v1197_v2 = vpop.f32.mrb[16].mxu0  ;;  %v55_v58 = vld [vmem:[%s1658_s1 + $0x78] sm:$0xff]  ;;  %s1272_s1 = smov [#allocation2]  }
 0x2a4   :  { %783 = vadd.xlane.f32.xlu0 %v782_v1  ;;  %v676_v3 = vadd.f32 %v1197_v2, %v1461_v11  ;;  %v760_v4 = vadd.f32 %v744_v60, %v722_v56  ;;  %v670_v5 = vpop.f32.mrb[17].mxu0  ;;  %v730_v62 = vmul.f32 %v1469_v13, %v55_v58  ;;  %s978_s22 = sshll.u32 %s1272_s1, 4  ;;  %s979_s22 = int_to_ptr.vmem [resolvable:$true] %s978_s22 }
 0x2a5   :  { %v671_v6 = vadd.f32 %v1461_v11, %v670_v5  ;;  %v759_v7 = vadd.f32 %v743_v0, %v721_v59  ;;  %s1247_s23 = scalar_lea.vmem %s979_s22, 16  ;;  %s1251_s24 = scalar_lea.vmem %s979_s22, 32 }
 0x2a6   :  { %v746_v15 = vmul.f32 %v1474_v14, %v676_v3  ;;  %v791_v16 = vsel %vm769_vm2, %v760_v4, 0.0  ;;  %p1248_p0 = scmp.ne.s32.totalorder %s979_s22, %s1247_s23  ;;  %p1252_p1 = scmp.lt.s32.totalorder %s979_s22, %s979_s22 }
 0x2a7   :  { %786 = vadd.xlane.f32.xlu1 %v785_v12  ;;  %v1200_v17 = vpop.f32.mrb[18].mxu0  ;;  %v745_v22 = vmul.f32 %v1474_v14, %v671_v6  ;;  %v788_v23 = vsel %vm769_vm2, %v759_v7, 0.0  ;;  %v823_v6 = vlaneseq  ;;  %p1253_p2 = scmp.lt.s32.totalorder %s1251_s24, %s1247_s23 }
 0x2a8   :  { %792 = vadd.xlane.f32.xlu0 %v791_v16  ;;  %v686_v18 = vadd.f32 %v1200_v17, %v1461_v11  ;;  %v680_v19 = vpop.f32.mrb[19].mxu0  ;;  %v762_v25 = vadd.f32 %v746_v15, %v724_v8 }
 0x2a9   :  { %v681_v24 = vadd.f32 %v1461_v11, %v680_v19  ;;  %v761_v35 = vadd.f32 %v745_v22, %v723_v20  ;;  %v1588_v9 = vshrl.u32 %v823_v6, 7  ;;  %v1591_v10 = vand.u32 127, %v823_v6  ;;  %p1254_p3 = por %p1253_p2, %p1252_p1 }
 0x2aa   :  { %v748_v27 = vmul.f32 %v1474_v14, %v686_v18  ;;  %v797_v33 = vsel %vm769_vm2, %v762_v25, 0.0 }
 0x2ab   :  { %v1203_v28 = vpop.f32.mrb[20].mxu0  ;;  %v747_v32 = vmul.f32 %v1474_v14, %v681_v24  ;;  %v794_v42 = vsel %vm769_vm2, %v761_v35, 0.0  ;;  %v825_v13 = vsub.s32 0, %v1588_v9  ;;  %v865_v17 = vadd.s32 4294967288, %v1591_v10  ;;  %p1255_p4 = pnand %p1254_p3, %p1248_p0 }
 0x2ac   :  { %789 = vadd.xlane.f32.xlu0 %v788_v23  ;;  %v690_v29 = vpop.f32.mrb[21].mxu0  ;;  %v764_v31 = vadd.f32 %v748_v27, %v726_v21  ;;  %v696_v34 = vadd.f32 %v1203_v28, %v1461_v11  ;;  %v872_v18 = vadd.s32 4294967280, %v1591_v10  ;;  %v863_v22 = vsub.s32 %v1591_v10, %v1588_v9 }
 0x2ad   :  { %v691_v43 = vadd.f32 %v1461_v11, %v690_v29  ;;  %v763_v44 = vadd.f32 %v747_v32, %v725_v30  ;;  %v868_v23 = vsub.s32 %v865_v17, %v1588_v9  ;;  %v879_v28 = vadd.s32 4294967272, %v1591_v10 }
 0x2ae   :  { %v803_v37 = vsel %vm769_vm2, %v764_v31, 0.0  ;;  %v750_v41 = vmul.f32 %v1474_v14, %v696_v34  ;;  %v875_v25 = vsub.s32 %v872_v18, %v1588_v9  ;;  %v886_v31 = vadd.s32 4294967264, %v1591_v10 }
 0x2af   :  { %v1206_v38 = vpop.f32.mrb[22].mxu0  ;;  %v749_v47 = vmul.f32 %v1474_v14, %v691_v43  ;;  %v800_v49 = vsel %vm769_vm2, %v763_v44, 0.0  ;;  %v882_v34 = vsub.s32 %v879_v28, %v1588_v9  ;;  %v893_v35 = vadd.s32 4294967256, %v1591_v10 }
 0x2b0   :  { %798 = vadd.xlane.f32.xlu0 %v797_v33  ;;  %v700_v39 = vpop.f32.mrb[23].mxu0  ;;  %v766_v51 = vadd.f32 %v750_v41, %v728_v40  ;;  %v706_v54 = vadd.f32 %v1206_v38, %v1461_v11  ;;  %v889_v38 = vsub.s32 %v886_v31, %v1588_v9  ;;  %v900_v41 = vadd.s32 4294967248, %v1591_v10 }
 0x2b1   :  { %v701_v50 = vadd.f32 %v1461_v11, %v700_v39  ;;  %v765_v57 = vadd.f32 %v749_v47, %v727_v46  ;;  %v896_v44 = vsub.s32 %v893_v35, %v1588_v9  ;;  %v907_v47 = vadd.s32 4294967240, %v1591_v10 }
 0x2b2   :  { %v809_v56 = vsel %vm769_vm2, %v766_v51, 0.0  ;;  %v752_v59 = vmul.f32 %v1474_v14, %v706_v54  ;;  %v903_v46 = vsub.s32 %v900_v41, %v1588_v9  ;;  %v949_v6 = vadd.s32 4294967192, %v1591_v10 }
 0x2b3   :  { %v751_v55 = vmul.f32 %v1474_v14, %v701_v50  ;;  %v806_v60 = vsel %vm769_vm2, %v765_v57, 0.0  ;;  %v914_v50 = vadd.s32 4294967232, %v1591_v10 }
 0x2b4   :  { %795 = vadd.xlane.f32.xlu0 %v794_v42  ;;  %v768_v63 = vadd.f32 %v752_v59, %v730_v62 }
 0x2b5   :  { %v767_v61 = vadd.f32 %v751_v55, %v729_v53  ;;  %v921_v53 = vadd.s32 4294967224, %v1591_v10  ;;  %v917_v58 = vsub.s32 %v914_v50, %v1588_v9 }
 0x2b6   :  { %v815_v0 = vsel %vm769_vm2, %v768_v63, 0.0 }
 0x2b7   :  { %v812_v11 = vsel %vm769_vm2, %v767_v61, 0.0 }
 0x2b8   :  { %820 = vperm.xlu1 %1245, %v61_v48   ;;  %801 = vadd.xlane.f32.xlu0 %v800_v49 }
 0x2bc   :  { %810 = vadd.xlane.f32.xlu0 %v809_v56  ;;  %v910_v56 = vsub.s32 %v907_v47, %v1588_v9 }
 0x2c0   :  { %807 = vadd.xlane.f32.xlu0 %v806_v60  ;;  %v928_v60 = vadd.s32 4294967216, %v1591_v10 }
 0x2c4   :  { %813 = vadd.xlane.f32.xlu0 %v812_v11  ;;  %v924_v11 = vsub.s32 %v921_v53, %v1588_v9 }
 0x2c8   :  { %816 = vadd.xlane.f32.xlu0 %v815_v0  ;;  %v935_v0 = vadd.s32 4294967208, %v1591_v10 }
 0x2dc   :  { %804 = vadd.xlane.f32.xlu1 %v803_v37 }
 0x328   :  { %v775_v1 = vpop.xlane.xlu0 %774 }
 0x32c   :  { %v772_v2 = vpop.xlane.xlu0 %771  ;;  %v781_v3 = vpop.xlane.xlu1 %780 }
 0x330   :  { %v778_v5 = vpop.xlane.xlu1 %777 }
 0x331   :  { %v784_v4 = vpop.xlane.xlu0 %783 }
 0x334   :  { %v787_v7 = vpop.xlane.xlu1 %786 }
 0x335   :  { %v793_v14 = vpop.xlane.xlu0 %792 }
 0x338   :  { %v821_v12 = vpop.permute.xlu1 %820 }
 0x339   :  { %v790_v8 = vpop.xlane.xlu0 %789  ;;  %v1593_v16 = vrot.slane %v821_v12, %v825_v13  ;;  %v938_v13 = vsub.s32 %v935_v0, %v1588_v9 }
 0x33b   :  { %v827_v20 = vadd.f32 %v1593_v16, %v772_v2  ;;  %v828_v21 = vadd.f32 %v1593_v16, %v775_v1  ;;  %v829_v24 = vadd.f32 %v1593_v16, %v778_v5  ;;  %v830_v32 = vadd.f32 %v1593_v16, %v781_v3 }
 0x33c   :  { %v831_v36 = vadd.f32 %v1593_v16, %v784_v4  ;;  %v832_v42 = vadd.f32 %v1593_v16, %v787_v7  ;;  %v833_v49 = vadd.f32 %v1593_v16, %v790_v8  ;;  %v834_v55 = vadd.f32 %v1593_v16, %v793_v14 }
 0x33d   :  { %v799_v15 = vpop.xlane.xlu0 %798  ;;  %v864_v26 = vrot.slane %v827_v20, %v863_v22  ;;  %v869_v27 = vrot.slane %v828_v21, %v868_v23  ;;  %v876_v30 = vrot.slane %v829_v24, %v875_v25  ;;  %v883_v40 = vrot.slane %v830_v32, %v882_v34 }
 0x33e   :  { %v890_v45 = vrot.slane %v831_v36, %v889_v38  ;;  %v897_v52 = vrot.slane %v832_v42, %v896_v44  ;;  %v904_v57 = vrot.slane %v833_v49, %v903_v46  ;;  %v911_v63 = vrot.slane %v834_v55, %v910_v56 }
 0x33f   :  { %v871_v33 = vsel %vm870_vm3, %v869_v27, %v864_v26  ;;  %v931_v2 = vsub.s32 %v928_v60, %v1588_v9  ;;  %v942_v4 = vadd.s32 4294967200, %v1591_v10  ;;  %v836_v5 = vadd.f32 %v1593_v16, %v799_v15 }
 0x340   :  { %v878_v37 = vsel %vm877_vm4, %v876_v30, %v871_v33  ;;  %v956_v7 = vadd.s32 4294967184, %v1591_v10  ;;  %v963_v8 = vadd.s32 4294967176, %v1591_v10  ;;  %v952_v22 = vsub.s32 %v949_v6, %v1588_v9 }
 0x341   :  { %v796_v19 = vpop.xlane.xlu0 %795  ;;  %v885_v43 = vsel %vm884_vm5, %v883_v40, %v878_v37  ;;  %v945_v18 = vsub.s32 %v942_v4, %v1588_v9  ;;  %v925_v21 = vrot.slane %v836_v5, %v924_v11 }
 0x342   :  { %v892_v48 = vsel %vm891_vm6, %v890_v45, %v885_v43  ;;  %v835_v59 = vadd.f32 %v1593_v16, %v796_v19  ;;  %v959_v10 = vsub.s32 %v956_v7, %v1588_v9  ;;  %v966_v26 = vsub.s32 %v963_v8, %v1588_v9 }
 0x343   :  { %v899_v54 = vsel %vm898_vm7, %v897_v52, %v892_v48 }
 0x344   :  { %v906_v61 = vsel %vm905_vm8, %v904_v57, %v899_v54  ;;  %v918_v1 = vrot.slane %v835_v59, %v917_v58 }
 0x345   :  { %v802_v29 = vpop.xlane.xlu0 %801  ;;  %v913_v14 = vsel %vm912_vm9, %v911_v63, %v906_v61 }
 0x346   :  { %v837_v3 = vadd.f32 %v1593_v16, %v802_v29  ;;  %v920_v12 = vsel %vm919_vm10, %v918_v1, %v913_v14 }
 0x347   :  { %v927_v27 = vsel %vm926_vm11, %v925_v21, %v920_v12 }
 0x348   :  { %v932_v17 = vrot.slane %v837_v3, %v931_v2 }
 0x349   :  { %v811_v39 = vpop.xlane.xlu0 %810 }
 0x34a   :  { %v840_v23 = vadd.f32 %v1593_v16, %v811_v39  ;;  %v934_v30 = vsel %vm933_vm12, %v932_v17, %v927_v27 }
 0x34c   :  { %v953_v32 = vrot.slane %v840_v23, %v952_v22 }
 0x34d   :  { %v808_v51 = vpop.xlane.xlu0 %807 }
 0x34e   :  { %v839_v19 = vadd.f32 %v1593_v16, %v808_v51 }
 0x350   :  { %v946_v31 = vrot.slane %v839_v19, %v945_v18 }
 0x351   :  { %v814_v62 = vpop.xlane.xlu0 %813 }
 0x352   :  { %v841_v25 = vadd.f32 %v1593_v16, %v814_v62 }
 0x354   :  { %v960_v34 = vrot.slane %v841_v25, %v959_v10 }
 0x355   :  { %v817_v20 = vpop.xlane.xlu0 %816 }
 0x356   :  { %v842_v28 = vadd.f32 %v1593_v16, %v817_v20 }
 0x358   :  { %v967_v9 = vrot.slane %v842_v28, %v966_v26 }
 0x369   :  { %v805_v15 = vpop.xlane.xlu1 %804 }
 0x36a   :  { %v838_v24 = vadd.f32 %v1593_v16, %v805_v15 }
 0x36c   :  { %v939_v29 = vrot.slane %v838_v24, %v938_v13 }
 0x36e   :  { %v941_v33 = vsel %vm940_vm13, %v939_v29, %v934_v30 }
 0x36f   :  { %v948_v35 = vsel %vm947_vm14, %v946_v31, %v941_v33 }
 0x370   :  { %v955_v36 = vsel %vm954_vm15, %v953_v32, %v948_v35 }
 0x371   :  { %v962_v37 = vsel %vm961_vm0, %v960_v34, %v955_v36 }
 0x372   :  { %v969_v38 = vsel %vm968_vm1, %v967_v9, %v962_v37 }
 0x373   :  { %971 = vst [vmem:[#allocation2] sm:$0x1] %v969_v38 }
 0x374   :  { %1258 = shalt.err (!%p1255_p4)
}
 0x375   :  { %s1259_s27 = scalar_lea.hbm %s1663_s6, 16 }
 0x376   :  { %p1260_p5 = scmp.ne.s32.totalorder %s1663_s6, %s1259_s27  ;;  %p1263_p6 = scmp.lt.u32.totalorder %s1259_s27, %s1663_s6 }
 0x378   :  { %p1265_p7 = pnand %p1263_p6, %p1260_p5 }
 0x37a   :  { %1268 = shalt.err (!%p1265_p7)
}
 0x37b   :  { %981 = dma.vmem_to_hbm [thread:$0]  %s979_s22, 16, %s1663_s6, [#allocation3]  }
 0x37c   :  { %1269 = dma.done.wait [#allocation3], 16  }
 0x37d   :  { %1270 = vsyncadd [#allocation3], 4294967280 }
 0x37e   :  { %985 = vsyncpa [#allocation3], 1 }

</bundles_post_ra>
